<compile_context>
chip_gen: v7x
topology: tpu7x:2x2x1
jax: 0.10.0
libtpu: 0.0.40
codegen_flags: <defaults>
</compile_context>

<pallas_src>
import functools

import jax
import jax.numpy as jnp
import numpy as np
from jax.experimental import pallas as pl
from jax.experimental.pallas import tpu as pltpu


_LANES = 512                               # lane axis width (multiple of 128)
_TARGET_BLOCK_BYTES = 2 * 1024 * 1024      # ~2 MiB blocks: safe on v7x's 64 MiB VMEM


def _round_up(a, b):
    return ((a + b - 1) // b) * b


def _choose_tiling(total, itemsize):
    """Pick a lane-dense (rows, cols) layout and a block row count."""
    cols = _LANES
    rows = max(1, -(-total // cols))
    # Block rows: multiple of 8 (sublane), capped so one block stays ~2 MiB.
    max_block_rows = max(8, (_TARGET_BLOCK_BYTES // (cols * itemsize)) // 8 * 8)
    block_rows = min(_round_up(rows, 8), max_block_rows)
    padded_rows = _round_up(rows, block_rows)
    return cols, block_rows, padded_rows


# ---------------------------------------------------------------------------
# Pass 1: global min / max reduction (range_tracker)
# ---------------------------------------------------------------------------
def _minmax_kernel(x_ref, min_ref, max_ref):
    i = pl.program_id(0)
    x = x_ref[...].astype(jnp.float32)
    tile_min = jnp.min(x, keepdims=True)   # (1, 1)
    tile_max = jnp.max(x, keepdims=True)   # (1, 1)

    @pl.when(i == 0)
    def _():
        min_ref[...] = tile_min
        max_ref[...] = tile_max

    @pl.when(i > 0)
    def _():
        min_ref[...] = jnp.minimum(min_ref[...], tile_min)
        max_ref[...] = jnp.maximum(max_ref[...], tile_max)


# ---------------------------------------------------------------------------
# Pass 2: elementwise quantize -> round -> clamp -> dequantize
# ---------------------------------------------------------------------------
def _fakequant_kernel(params_ref, x_ref, o_ref, *, qmin, qmax):
    scale = params_ref[0]        # scalar reads from SMEM
    zero_point = params_ref[1]
    inv_scale = params_ref[2]    # hoisted reciprocal: no per-element divide

    x = x_ref[...].astype(jnp.float32)
    q = jnp.round(x * scale - zero_point)          # quantize + Round.apply
    q = jnp.clip(q, qmin, qmax)                    # clamp
    o_ref[...] = ((q + zero_point) * inv_scale).astype(o_ref.dtype)  # dequantize


@functools.partial(jax.jit, static_argnums=(1,))
def _quantizer_forward_impl(x, bits):
    qmin = 0.0
    qmax = float((1 << bits) - 1)

    orig_shape = x.shape
    flat = x.reshape(-1)
    total = flat.shape[0]
    cols, block_rows, padded_rows = _choose_tiling(total, x.dtype.itemsize)
    pad = padded_rows * cols - total
    # Edge padding: padded values are copies of the last element, so the global
    # min/max (and hence scale/zero_point) are unaffected; padded outputs are
    # sliced off below.
    flat = jnp.pad(flat, (0, pad), mode="edge")
    x2 = flat.reshape(padded_rows, cols)
    n_blocks = padded_rows // block_rows

    # ---- pass 1: tiled global min / max (range_tracker) ----
    min_val, max_val = pl.pallas_call(
        _minmax_kernel,
        grid=(n_blocks,),
        in_specs=[pl.BlockSpec((block_rows, cols), lambda i: (i, 0))],
        out_specs=(
            pl.BlockSpec((1, 1), lambda i: (0, 0)),
            pl.BlockSpec((1, 1), lambda i: (0, 0)),
        ),
        out_shape=(
            jax.ShapeDtypeStruct((1, 1), jnp.float32),
            jax.ShapeDtypeStruct((1, 1), jnp.float32),
        ),
        compiler_params=pltpu.CompilerParams(
            dimension_semantics=("arbitrary",)),   # reduction axis
    )(x2)

    # ---- update_params(): asymmetric unsigned scale / zero_point ----
    min_val = min_val[0, 0]
    max_val = max_val[0, 0]
    float_range = max_val - min_val
    # Guard against constant input (range == 0) -> avoid inf/NaN.
    float_range = jnp.where(float_range > 0, float_range, jnp.float32(1.0))
    scale = (qmax - qmin) / float_range
    zero_point = jnp.round(min_val * scale) - qmin
    inv_scale = 1.0 / scale
    params = jnp.stack([scale, zero_point, inv_scale]).astype(jnp.float32)

    # ---- pass 2: tiled elementwise fake-quant ----
    out2 = pl.pallas_call(
        functools.partial(_fakequant_kernel, qmin=qmin, qmax=qmax),
        grid=(n_blocks,),
        in_specs=[
            pl.BlockSpec(memory_space=pltpu.MemorySpace.SMEM),       # scalars
            pl.BlockSpec((block_rows, cols), lambda i: (i, 0)),      # x tile
        ],
        out_specs=pl.BlockSpec((block_rows, cols), lambda i: (i, 0)),
        out_shape=jax.ShapeDtypeStruct((padded_rows, cols), x.dtype),
        input_output_aliases={1: 0},   # reuse the padded input HBM buffer
        compiler_params=pltpu.CompilerParams(
            dimension_semantics=("parallel",)),    # shard across TCs on v7x
    )(params, x2)

    out = out2.reshape(-1)[:total].reshape(orig_shape)
    return out, scale, zero_point


def quantizer_forward(x, bits=8):
    """Forward pass of Quantizer. Returns (output, scale, zero_point)."""
    if bits == 32:
        return x, None, None
    assert bits != 1, "Binary quantization is not supported"
    return _quantizer_forward_impl(x, bits)


def _reference_forward(x, bits=8):
    """Pure-JAX reference for correctness checking."""
    if bits == 32:
        return x
    qmin = 0.0
    qmax = float((1 << bits) - 1)
    min_val = jnp.min(x).astype(jnp.float32)
    max_val = jnp.max(x).astype(jnp.float32)
    float_range = max_val - min_val
    float_range = jnp.where(float_range > 0, float_range, jnp.float32(1.0))
    scale = (qmax - qmin) / float_range
    zero_point = jnp.round(min_val * scale) - qmin
    q = jnp.clip(jnp.round(x.astype(jnp.float32) * scale - zero_point), qmin, qmax)
    return ((q + zero_point) / scale).astype(x.dtype)


if __name__ == "__main__":
    key = jax.random.PRNGKey(0)
    x = jax.random.normal(key, (2, 4, 16, 16), dtype=jnp.float32)  # NCHW

    out, scale, zero_point = quantizer_forward(x, bits=8)
    out = jax.block_until_ready(out)
    ref = _reference_forward(x, bits=8)
    np.testing.assert_allclose(np.asarray(out), np.asarray(ref), rtol=1e-5, atol=1e-5)

    # A shape whose flattened size is not a multiple of the tile (exercises padding).
    x_odd = jax.random.normal(jax.random.PRNGKey(1), (2, 3, 7, 7), dtype=jnp.float32)
    out_odd, _, _ = quantizer_forward(x_odd, bits=4)
    out_odd = jax.block_until_ready(out_odd)
    ref_odd = _reference_forward(x_odd, bits=4)
    np.testing.assert_allclose(np.asarray(out_odd), np.asarray(ref_odd),
                               rtol=1e-5, atol=1e-5)

    # bits == 32 passthrough path
    out32, _, _ = quantizer_forward(x, bits=32)
    np.testing.assert_allclose(np.asarray(out32), np.asarray(x))

    print("KERNEL_OK")
</pallas_src>

<mosaic_0001>
module attributes {stable_mosaic.version = 11 : i64} {
  func.func @_minmax_kernel(%arg0: i32, %arg1: memref<8x512xf32, #tpu.memory_space<vmem>>, %arg2: memref<1x1xf32, #tpu.memory_space<vmem>>, %arg3: memref<1x1xf32, #tpu.memory_space<vmem>>) attributes {dimension_semantics = [#tpu.dimension_semantics<arbitrary>], iteration_bounds = array<i64: 1>, scalar_prefetch = 0 : i64, scratch_operands = 0 : i64, tpu.core_type = #tpu.core_type<tc>, window_params = [{transform_indices = @transform_0, window_bounds = array<i64: 8, 512>}, {pipeline_mode = #tpu.pipeline_mode<synchronous>, transform_indices = @transform_1, window_bounds = array<i64: 1, 1>}, {pipeline_mode = #tpu.pipeline_mode<synchronous>, transform_indices = @transform_2, window_bounds = array<i64: 1, 1>}]} {
    %c0 = arith.constant 0 : index
    %c0_0 = arith.constant 0 : index
    %0 = vector.load %arg1[%c0, %c0_0] : memref<8x512xf32, #tpu.memory_space<vmem>>, vector<8x512xf32>
    %1 = vector.shape_cast %0 : vector<8x512xf32> to vector<1x8x512xf32>
    %cst = arith.constant dense<0x7F800000> : vector<1xf32>
    %2 = vector.multi_reduction <minimumf>, %1, %cst [1, 2] : vector<1x8x512xf32> to vector<1xf32>
    %3 = vector.shape_cast %2 : vector<1xf32> to vector<1x1x1xf32>
    %4 = vector.extract %3[0, 0, 0] : f32 from vector<1x1x1xf32>
    %5 = vector.broadcast %4 : f32 to vector<1x1xf32>
    %6 = vector.shape_cast %0 : vector<8x512xf32> to vector<1x8x512xf32>
    %cst_1 = arith.constant dense<0xFF800000> : vector<1xf32>
    %7 = vector.multi_reduction <maximumf>, %6, %cst_1 [1, 2] : vector<1x8x512xf32> to vector<1xf32>
    %8 = vector.shape_cast %7 : vector<1xf32> to vector<1x1x1xf32>
    %9 = vector.extract %8[0, 0, 0] : f32 from vector<1x1x1xf32>
    %10 = vector.broadcast %9 : f32 to vector<1x1xf32>
    %c0_i32 = arith.constant 0 : i32
    %11 = arith.cmpi eq, %arg0, %c0_i32 : i32
    %12 = arith.extui %11 : i1 to i32
    %c0_i32_2 = arith.constant 0 : i32
    %13 = arith.cmpi ne, %12, %c0_i32_2 : i32
    scf.if %13 {
      %c0_5 = arith.constant 0 : index
      %c0_6 = arith.constant 0 : index
      %17 = vector.load %arg2[%c0_5, %c0_6] : memref<1x1xf32, #tpu.memory_space<vmem>>, vector<1x1xf32>
      tpu.vector_store %arg2[%c0_5, %c0_6], %5 {strides = array<i32>} : memref<1x1xf32, #tpu.memory_space<vmem>>, vector<1x1xf32>,
      %c0_7 = arith.constant 0 : index
      %c0_8 = arith.constant 0 : index
      %18 = vector.load %arg3[%c0_7, %c0_8] : memref<1x1xf32, #tpu.memory_space<vmem>>, vector<1x1xf32>
      tpu.vector_store %arg3[%c0_7, %c0_8], %10 {strides = array<i32>} : memref<1x1xf32, #tpu.memory_space<vmem>>, vector<1x1xf32>,
    } else {
    }
    %c0_i32_3 = arith.constant 0 : i32
    %14 = arith.cmpi sgt, %arg0, %c0_i32_3 : i32
    %15 = arith.extui %14 : i1 to i32
    %c0_i32_4 = arith.constant 0 : i32
    %16 = arith.cmpi ne, %15, %c0_i32_4 : i32
    scf.if %16 {
      %c0_5 = arith.constant 0 : index
      %c0_6 = arith.constant 0 : index
      %17 = vector.load %arg2[%c0_5, %c0_6] : memref<1x1xf32, #tpu.memory_space<vmem>>, vector<1x1xf32>
      %18 = arith.minimumf %17, %5 : vector<1x1xf32>
      %c0_7 = arith.constant 0 : index
      %c0_8 = arith.constant 0 : index
      %19 = vector.load %arg2[%c0_7, %c0_8] : memref<1x1xf32, #tpu.memory_space<vmem>>, vector<1x1xf32>
      tpu.vector_store %arg2[%c0_7, %c0_8], %18 {strides = array<i32>} : memref<1x1xf32, #tpu.memory_space<vmem>>, vector<1x1xf32>,
      %c0_9 = arith.constant 0 : index
      %c0_10 = arith.constant 0 : index
      %20 = vector.load %arg3[%c0_9, %c0_10] : memref<1x1xf32, #tpu.memory_space<vmem>>, vector<1x1xf32>
      %21 = arith.maximumf %20, %10 : vector<1x1xf32>
      %c0_11 = arith.constant 0 : index
      %c0_12 = arith.constant 0 : index
      %22 = vector.load %arg3[%c0_11, %c0_12] : memref<1x1xf32, #tpu.memory_space<vmem>>, vector<1x1xf32>
      tpu.vector_store %arg3[%c0_11, %c0_12], %21 {strides = array<i32>} : memref<1x1xf32, #tpu.memory_space<vmem>>, vector<1x1xf32>,
    } else {
    }
    return
  }
  func.func @transform_0(%arg0: i32) -> (i32, i32) {
    %c0_i32 = arith.constant 0 : i32
    %c0_i32_0 = arith.constant 0 : i32
    return %arg0, %c0_i32 : i32, i32
  }
  func.func @transform_1(%arg0: i32) -> (i32, i32) {
    %c0_i32 = arith.constant 0 : i32
    %c0_i32_0 = arith.constant 0 : i32
    %c0_i32_1 = arith.constant 0 : i32
    return %c0_i32, %c0_i32_0 : i32, i32
  }
  func.func @transform_2(%arg0: i32) -> (i32, i32) {
    %c0_i32 = arith.constant 0 : i32
    %c0_i32_0 = arith.constant 0 : i32
    %c0_i32_1 = arith.constant 0 : i32
    return %c0_i32, %c0_i32_0 : i32, i32
  }
}

module attributes {stable_mosaic.version = 11 : i64} {
  func.func @_fakequant_kernel(%arg0: i32, %arg1: memref<3xf32, #tpu.memory_space<smem>>, %arg2: memref<8x512xf32, #tpu.memory_space<vmem>>, %arg3: memref<8x512xf32, #tpu.memory_space<vmem>>) attributes {dimension_semantics = [#tpu.dimension_semantics<parallel>], iteration_bounds = array<i64: 1>, scalar_prefetch = 0 : i64, scratch_operands = 0 : i64, tpu.core_type = #tpu.core_type<tc>, window_params = [{transform_indices = @transform_0, window_bounds = array<i64: 3>}, {transform_indices = @transform_1, window_bounds = array<i64: 8, 512>}, {transform_indices = @transform_2, window_bounds = array<i64: 8, 512>}]} {
    %c0 = arith.constant 0 : index
    %0 = memref.load %arg1[%c0] : memref<3xf32, #tpu.memory_space<smem>>
    %c1 = arith.constant 1 : index
    %1 = memref.load %arg1[%c1] : memref<3xf32, #tpu.memory_space<smem>>
    %c2 = arith.constant 2 : index
    %2 = memref.load %arg1[%c2] : memref<3xf32, #tpu.memory_space<smem>>
    %c0_0 = arith.constant 0 : index
    %c0_1 = arith.constant 0 : index
    %3 = vector.load %arg2[%c0_0, %c0_1] : memref<8x512xf32, #tpu.memory_space<vmem>>, vector<8x512xf32>
    %4 = vector.broadcast %0 : f32 to vector<8x512xf32>
    %5 = arith.mulf %3, %4 : vector<8x512xf32>
    %6 = vector.broadcast %1 : f32 to vector<8x512xf32>
    %7 = arith.subf %5, %6 : vector<8x512xf32>
    %8 = math.roundeven %7 : vector<8x512xf32>
    %cst = arith.constant 0.000000e+00 : f32
    %cst_2 = arith.constant 2.550000e+02 : f32
    %9 = vector.broadcast %cst : f32 to vector<8x512xf32>
    %10 = arith.maximumf %9, %8 : vector<8x512xf32>
    %11 = vector.broadcast %cst_2 : f32 to vector<8x512xf32>
    %12 = arith.minimumf %11, %10 : vector<8x512xf32>
    %13 = vector.broadcast %1 : f32 to vector<8x512xf32>
    %14 = arith.addf %12, %13 : vector<8x512xf32>
    %15 = vector.broadcast %2 : f32 to vector<8x512xf32>
    %16 = arith.mulf %14, %15 : vector<8x512xf32>
    %c0_3 = arith.constant 0 : index
    %c0_4 = arith.constant 0 : index
    %17 = vector.load %arg3[%c0_3, %c0_4] : memref<8x512xf32, #tpu.memory_space<vmem>>, vector<8x512xf32>
    tpu.vector_store %arg3[%c0_3, %c0_4], %16 {strides = array<i32>} : memref<8x512xf32, #tpu.memory_space<vmem>>, vector<8x512xf32>,
    return
  }
  func.func @transform_0(%arg0: i32) -> i32 {
    %c0_i32 = arith.constant 0 : i32
    %c0_i32_0 = arith.constant 0 : i32
    return %c0_i32 : i32
  }
  func.func @transform_1(%arg0: i32) -> (i32, i32) {
    %c0_i32 = arith.constant 0 : i32
    %c0_i32_0 = arith.constant 0 : i32
    return %arg0, %c0_i32 : i32, i32
  }
  func.func @transform_2(%arg0: i32) -> (i32, i32) {
    %c0_i32 = arith.constant 0 : i32
    %c0_i32_0 = arith.constant 0 : i32
    return %arg0, %c0_i32 : i32, i32
  }
}

</mosaic_0001>

<bundles_post_ra>
// kernel: _quantizer_forward_impl.2
= control target key start
LH: loop header
LB: loop body
LE: loop exit
PB: predicated region body
PF: predicated region fallthrough
CT: control target
= control target key end

     0   :  { %8 = vsyncpa [#allocation3], 0  ;;  %s197_s0 = inlined_call_operand.vmem [shape: f32[8,512], index: 0, kind: input, shape index: {}]   ;;  %s198_s1 = inlined_call_operand.hbm [shape: f32[1,1], index: 1, kind: output, shape index: {0}]   ;;  %s199_s2 = inlined_call_operand.hbm [shape: f32[1,1], index: 2, kind: output, shape index: {1}]  }
   0x1   :  { %v12_v0 = vld [vmem:[%s197_s0] sm:$0xff]  ;;  %v13_v1 = vld [vmem:[%s197_s0 + $0x8] sm:$0xff]  ;;  %v14_v2 = vld [vmem:[%s197_s0 + $0x10] sm:$0xff] }
   0x2   :  { %v15_v3 = vld [vmem:[%s197_s0 + $0x18] sm:$0xff]  ;;  %v16_v4 = vmin.f32 %v12_v0, %v13_v1 }
   0x3   :  { %9 = vsyncpa [#allocation5], 0  ;;  %v17_v5 = vmin.f32 %v14_v2, %v15_v3  ;;  %v29_v6 = vmax.f32 %v12_v0, %v13_v1  ;;  %v30_v7 = vmax.f32 %v14_v2, %v15_v3  ;;  %s142_s0 = smov [#allocation2]   ;;  %vm46_vm0 = vcmask 0   ;;  %s143_s19 = smov [#allocation4]  }
   0x4   :  { %s66_s17 = sshll.u32 %s142_s0, 4  ;;  %s76_s20 = sshll.u32 %s143_s19, 4  ;;  %s67_s17 = int_to_ptr.vmem [resolvable:$true] %s66_s17  ;;  %s77_s20 = int_to_ptr.vmem [resolvable:$true] %s76_s20 }
   0x5   :  { %v18_v8 = vmin.f32 %v16_v4, %v17_v5  ;;  %v31_v9 = vmax.f32 %v29_v6, %v30_v7  ;;  %s94_s21 = scalar_lea.vmem %s67_s17, 16  ;;  %s98_s22 = scalar_lea.vmem %s67_s17, 32 }
   0x6   :  { %p95_p0 = scmp.ne.s32.totalorder %s67_s17, %s94_s21  ;;  %p99_p1 = scmp.lt.s32.totalorder %s67_s17, %s67_s17 }
   0x7   :  { %19 = vmin.xlane.f32.xlu0 %v18_v8  ;;  %p100_p2 = scmp.lt.s32.totalorder %s98_s22, %s94_s21 }
   0x9   :  { %p101_p3 = por %p100_p2, %p99_p1 }
   0xb   :  { %32 = vmax.xlane.f32.xlu0 %v31_v9  ;;  %p102_p4 = pnand %p101_p3, %p95_p0 }
  0x94   :  { %v20_v10 = vpop.xlane.xlu0 %19 }
  0x95   :  { %v21_v11 = vrot.slane %v20_v10, 4 }
  0x97   :  { %v22_v12 = vmin.f32 %v20_v10, %v21_v11 }
  0x98   :  { %v33_v13 = vpop.xlane.xlu0 %32 }
  0x99   :  { %v23_v14 = vrot.slane %v22_v12, 2  ;;  %v34_v15 = vrot.slane %v33_v13, 4 }
  0x9b   :  { %v35_v16 = vmax.f32 %v33_v13, %v34_v15  ;;  %v24_v17 = vmin.f32 %v22_v12, %v23_v14 }
  0x9d   :  { %v36_v18 = vrot.slane %v35_v16, 2  ;;  %v25_v19 = vrot.slane %v24_v17, 1 }
  0x9f   :  { %v37_v20 = vmax.f32 %v35_v16, %v36_v18  ;;  %v26_v21 = vmin.f32 %v24_v17, %v25_v19 }
  0xa1   :  { %88 = vpush %v26_v21  ;;  %v38_v22 = vrot.slane %v37_v20, 1 }
  0xa3   :  { %v39_v23 = vmax.f32 %v37_v20, %v38_v22 }
  0xa5   :  { %90 = vpush %v39_v23 }
  0xd2   :  { %s89_s18 = spop %88 }
  0xd3   :  { %v28_v24 = vstv %s89_s18 }
  0xd4   :  { %47 = vst.msk [vmem:[#allocation2] sm:$0x1] %vm46_vm0, %v28_v24 }
  0xd5   :  { %105 = shalt.err (!%p102_p4)
}
  0xd6   :  { %s106_s25 = scalar_lea.hbm %s198_s1, 16 }
  0xd7   :  { %p107_p5 = scmp.ne.s32.totalorder %s198_s1, %s106_s25  ;;  %p110_p6 = scmp.lt.u32.totalorder %s106_s25, %s198_s1 }
  0xd9   :  { %p112_p7 = pnand %p110_p6, %p107_p5 }
  0xdb   :  { %115 = shalt.err (!%p112_p7)
}
  0xdc   :  { %69 = dma.vmem_to_hbm [thread:$0]  %s67_s17, 16, %s198_s1, [#allocation3]  }
  0xdd   :  { %s91_s4 = spop %90  ;;  %s116_s5 = scalar_lea.vmem %s77_s20, 16 }
  0xde   :  { %v41_v25 = vstv %s91_s4  ;;  %p117_p8 = scmp.ne.s32.totalorder %s77_s20, %s116_s5  ;;  %s120_s6 = scalar_lea.vmem %s77_s20, 32 }
  0xdf   :  { %48 = vst.msk [vmem:[#allocation4] sm:$0x1] %vm46_vm0, %v41_v25  ;;  %p121_p9 = scmp.lt.s32.totalorder %s77_s20, %s77_s20  ;;  %p122_p10 = scmp.lt.s32.totalorder %s120_s6, %s116_s5 }
  0xe1   :  { %p123_p11 = por %p122_p10, %p121_p9 }
  0xe3   :  { %p124_p12 = pnand %p123_p11, %p117_p8 }
  0xe5   :  { %127 = shalt.err (!%p124_p12)
}
  0xe6   :  { %s128_s9 = scalar_lea.hbm %s199_s2, 16 }
  0xe7   :  { %p129_p13 = scmp.ne.s32.totalorder %s199_s2, %s128_s9  ;;  %p132_p0 = scmp.lt.u32.totalorder %s128_s9, %s199_s2 }
  0xe9   :  { %p134_p1 = pnand %p132_p0, %p129_p13 }
  0xeb   :  { %137 = shalt.err (!%p134_p1)
}
  0xec   :  { %79 = dma.vmem_to_hbm [thread:$0]  %s77_s20, 16, %s199_s2, [#allocation5]  }
  0xed   :  { %138 = dma.done.wait [#allocation3], 16  }
  0xee   :  { %139 = vsyncadd [#allocation3], 4294967280 }
  0xef   :  { %140 = dma.done.wait [#allocation5], 16  }
  0xf0   :  { %141 = vsyncadd [#allocation5], 4294967280 }
  0xf1   :  { %86 = vsyncpa [#allocation3], 1 }
  0xf2   :  { %87 = vsyncpa [#allocation5], 1 }

// kernel: _quantizer_forward_impl.3
= control target key start
LH: loop header
LB: loop body
LE: loop exit
PB: predicated region body
PF: predicated region fallthrough
CT: control target
= control target key end

     0   :  { %7 = vsyncpa [#allocation3], 0  ;;  %s135_s0 = inlined_call_operand.vmem [shape: f32[3], index: 0, kind: input, shape index: {}]   ;;  %s136_s1 = inlined_call_operand.vmem [shape: f32[8,512], index: 1, kind: input, shape index: {}, may-alias: {1,2}]   ;;  %s137_s2 = inlined_call_operand.vmem [shape: f32[8,512], index: 2, kind: output, shape index: {}, may-alias: {1,2}]  }
   0x1   :  { %s14_s11 = sshll.u32 %s135_s0, 4  ;;  %s15_s11 = int_to_ptr.vmem [resolvable:$true] %s14_s11 }
   0x2   :  { %s78_s12 = scalar_lea.vmem %s15_s11, 16  ;;  %p83_p1 = scmp.lt.s32.totalorder %s15_s11, %s15_s11 }
   0x3   :  { %p79_p0 = scmp.ne.s32.totalorder %s15_s11, %s78_s12  ;;  %p84_p2 = scmp.lt.s32.totalorder %s78_s12, %s78_s12 }
   0x5   :  { %p85_p3 = por %p84_p2, %p83_p1 }
   0x7   :  { %p86_p4 = pnand %p85_p3, %p79_p0 }
   0x9   :  { %89 = shalt.err (!%p86_p4)
}
   0xa   :  { %s92_s13 = smov [#allocation2]  }
   0xb   :  { %17 = dma.vmem_to_smem %s15_s11, 16, %s92_s13, [#allocation3]  }
   0xc   :  { %90 = dma.done.wait [#allocation3], 16  }
   0xd   :  { %91 = vsyncadd [#allocation3], 4294967280 }
   0xe   :  { %23 = sfence }
   0xf   :  { %s24_s14 = sld [smem:[#allocation2]]  ;;  %s71_s15 = sld [smem:[#allocation2 + $0x1]]  ;;  %v27_v0 = vld [vmem:[%s136_s1] sm:$0xff]  ;;  %v28_v1 = vld [vmem:[%s136_s1 + $0x8] sm:$0xff]  ;;  %v29_v2 = vld [vmem:[%s136_s1 + $0x10] sm:$0xff] }
  0x10   :  { %v30_v3 = vld [vmem:[%s136_s1 + $0x18] sm:$0xff]  ;;  %s72_s23 = sld [smem:[#allocation2 + $0x2]] }
  0x15   :  { %v31_v4 = vstv %s24_s14  ;;  %v36_v5 = vstv %s71_s15 }
  0x16   :  { %v32_v6 = vmul.f32 %v31_v4, %v27_v0  ;;  %v33_v7 = vmul.f32 %v31_v4, %v28_v1  ;;  %v34_v8 = vmul.f32 %v31_v4, %v29_v2  ;;  %v35_v9 = vmul.f32 %v31_v4, %v30_v3 }
  0x17   :  { %v57_v25 = vstv %s72_s23 }
  0x18   :  { %v37_v10 = vsub.f32 %v32_v6, %v36_v5  ;;  %v38_v11 = vsub.f32 %v33_v7, %v36_v5  ;;  %v39_v12 = vsub.f32 %v34_v8, %v36_v5  ;;  %v40_v13 = vsub.f32 %v35_v9, %v36_v5 }
  0x1a   :  { %v73_v14 = vround.rtne.f32 %v37_v10  ;;  %v74_v15 = vround.rtne.f32 %v38_v11  ;;  %v75_v16 = vround.rtne.f32 %v39_v12  ;;  %v76_v17 = vround.rtne.f32 %v40_v13 }
  0x1c   :  { %v45_v18 = vmax.f32 %v73_v14, 0.0  ;;  %v46_v19 = vmax.f32 %v74_v15, 0.0  ;;  %v47_v20 = vmax.f32 %v75_v16, 0.0  ;;  %v48_v21 = vmax.f32 %v76_v17, 0.0 }
  0x1e   :  { %v49_v22 = vmin.f32 %v45_v18, 255.0  ;;  %v50_v23 = vmin.f32 %v46_v19, 255.0  ;;  %v51_v24 = vmin.f32 %v47_v20, 255.0  ;;  %v52_v26 = vmin.f32 %v48_v21, 255.0 }
  0x20   :  { %v53_v27 = vadd.f32 %v49_v22, %v36_v5  ;;  %v54_v28 = vadd.f32 %v50_v23, %v36_v5  ;;  %v55_v29 = vadd.f32 %v51_v24, %v36_v5  ;;  %v56_v30 = vadd.f32 %v52_v26, %v36_v5 }
  0x22   :  { %v58_v31 = vmul.f32 %v57_v25, %v53_v27  ;;  %v59_v32 = vmul.f32 %v57_v25, %v54_v28  ;;  %v60_v33 = vmul.f32 %v57_v25, %v55_v29  ;;  %v61_v34 = vmul.f32 %v57_v25, %v56_v30 }
  0x24   :  { %62 = vst [vmem:[%s137_s2] sm:$0xff] %v58_v31  ;;  %63 = vst [vmem:[%s137_s2 + $0x8] sm:$0xff] %v59_v32 }
  0x25   :  { %64 = vst [vmem:[%s137_s2 + $0x10] sm:$0xff] %v60_v33  ;;  %65 = vst [vmem:[%s137_s2 + $0x18] sm:$0xff] %v61_v34 }
  0x26   :  { %70 = vsyncpa [#allocation3], 1 }

</bundles_post_ra>
